<compile_context>
chip_gen: v7x
topology: tpu7x:2x2x1
jax: 0.10.0
libtpu: 0.0.40
codegen_flags: <defaults>
</compile_context>

<pallas_src>
import jax
import jax.numpy as jnp
from jax.experimental import pallas as pl
from jax.experimental.pallas import tpu as pltpu


def _make_kernel(C_in, C_out, L, k, pool, Bt, has_proj):
    p = k // 2

    def _pad_and_stack(a, c):
        # a: (c, L) f32 -> tap-stacked (k*c, L) with a zero halo of width p on each side.
        if p > 0:
            halo = jnp.zeros((c, p), jnp.float32)
            ap = jnp.concatenate([halo, a, halo], axis=-1)        # (c, L + 2p)
        else:
            ap = a
        return jnp.concatenate([ap[:, j:j + L] for j in range(k)], axis=0)

    def _shift_left(a, r):
        # a shifted left by r along lanes (wraparound lanes are never selected downstream).
        return jnp.concatenate([a[:, r:], a[:, :r]], axis=-1)

    def kernel(*refs):
        if has_proj:
            (x_ref, w1_ref, b1s_ref, b1b_ref, w2_ref, b2s_ref, b2b_ref,
             sw1_ref, sw2_ref, scw_ref, scs_ref, scb_ref, o_ref) = refs
        else:
            (x_ref, w1_ref, b1s_ref, b1b_ref, w2_ref, b2s_ref, b2b_ref,
             sw1_ref, sw2_ref, o_ref) = refs

        def row(r, carry):
            xr = x_ref[r].astype(jnp.float32)                     # (C_in, L)

            # conv1: single tap-stacked MXU matmul (bf16 operands, f32 acc) + BN1 + ReLU.
            rhs1 = _pad_and_stack(xr, C_in).astype(jnp.bfloat16)  # (k*C_in, L)
            h1 = jnp.dot(w1_ref[...], rhs1, preferred_element_type=jnp.float32)
            h1 = jnp.maximum(h1 * b1s_ref[...] + b1b_ref[...], 0.0)        # (C_out, L) f32

            # conv2 + BN2.
            rhs2 = _pad_and_stack(h1, C_out).astype(jnp.bfloat16)          # (k*C_out, L)
            pre = jnp.dot(w2_ref[...], rhs2, preferred_element_type=jnp.float32)
            pre = pre * b2s_ref[...] + b2b_ref[...]                         # (C_out, L) f32

            # SE squeeze/excitation: VPU broadcast-multiplies + XLU axis sums only
            # (no N=1 MXU matmuls); 1/L of the mean folded into sw1 wrapper-side.
            y = jnp.sum(pre, axis=-1, keepdims=True)                        # (C_out, 1)
            h = jnp.maximum(jnp.sum(sw1_ref[...] * y, axis=0, keepdims=True), 0.0)   # (1, H)
            s = jax.nn.sigmoid(jnp.sum(sw2_ref[...] * h, axis=-1, keepdims=True))    # (C_out, 1)

            # Shortcut: static specialization (projection conv+BN vs. plain identity).
            if has_proj:
                sc = jnp.dot(scw_ref[...], xr.astype(jnp.bfloat16),
                             preferred_element_type=jnp.float32)
                sc = sc * scs_ref[...] + scb_ref[...]
            else:
                sc = xr                                                     # C_in == C_out

            # Residual add + ReLU, then the MaxPool window max via shifted compares.
            z = jnp.maximum(pre * s + sc, 0.0)                              # (C_out, L)
            m = z
            for rr in range(1, pool):
                m = jnp.maximum(m, _shift_left(z, rr))
            # m[:, i] == max(z[:, i:i+pool]) at every lane the wrapper keeps (i % pool == 0).
            # The down-select happens wrapper-side so the writeback stays lane-dense and no
            # in-kernel lane relayout (reshape / strided select) is needed.
            # TODO(synk): nn.Dropout(0.3) is identity in inference; training-mode masking
            # (pltpu.prng_*) is not implemented here.
            o_ref[r] = m.astype(o_ref.dtype)
            return carry

        jax.lax.fori_loop(0, Bt, row, 0, unroll=True)

    return kernel


def _fold_bn(stats, eps=1e-5):
    gamma, beta, mean, var = stats
    scale = gamma / jnp.sqrt(var + eps)
    shift = beta - mean * scale
    return (scale.reshape(-1, 1).astype(jnp.float32),
            shift.reshape(-1, 1).astype(jnp.float32))


def _pick_batch_tile(B, cap=8):
    # Prefer an even number of grid steps (v7x has 2 TensorCores), then the largest batch
    # tile (amortizes ~0.35us per-grid-step overhead, bigger DMA transfers).
    divs = [d for d in range(1, min(B, cap) + 1) if B % d == 0]
    return max(divs, key=lambda d: ((B // d) % 2 == 0, d))


def residual_se_cnn_block(x, params, *, kernel_size, pool_size):
    """Forward pass of ResidualSECNNBlock (inference). x: (B, C_in, L); PyTorch layouts."""
    B, C_in, L = x.shape
    k = kernel_size
    # TODO(synk): PyTorch MaxPool1d floors a non-divisible length; here we require L % pool == 0.
    assert L % pool_size == 0, "L must be divisible by pool_size"
    C_out = params["conv1_w"].shape[0]
    has_proj = "sc_w" in params
    if not has_proj:
        assert C_in == C_out, "identity shortcut requires C_in == C_out"

    # Tap-stacked conv weights (C_out, k*C): w_stacked[o, j*C + c] = w[o, c, j]; bf16 for MXU.
    w1s = jnp.transpose(params["conv1_w"], (0, 2, 1)).reshape(C_out, k * C_in).astype(jnp.bfloat16)
    w2s = jnp.transpose(params["conv2_w"], (0, 2, 1)).reshape(C_out, k * C_out).astype(jnp.bfloat16)
    b1s, b1b = _fold_bn(params["bn1"])
    b2s, b2b = _fold_bn(params["bn2"])
    # SE weights: fold 1/L of the squeeze-mean into FC1 and pre-transpose it so the kernel
    # only needs broadcast multiplies + axis reductions (no in-kernel transposes).
    sw1t = (params["se_w1"].astype(jnp.float32) / L).T           # (C_out, H)
    sw2 = params["se_w2"].astype(jnp.float32)                    # (C_out, H)

    args = [x, w1s, b1s, b1b, w2s, b2s, b2b, sw1t, sw2]
    if has_proj:
        scw = params["sc_w"][:, :, 0].astype(jnp.bfloat16)        # (C_out, C_in)
        scs, scb = _fold_bn(params["sc_bn"])
        args += [scw, scs, scb]

    Bt = _pick_batch_tile(B)
    kernel = _make_kernel(C_in, C_out, L, k, pool_size, Bt, has_proj)

    def _resident(a):  # small parameter arrays: VMEM-resident, constant index_map
        nd = a.ndim
        return pl.BlockSpec(a.shape, lambda b, _nd=nd: (0,) * _nd)

    in_specs = ([pl.BlockSpec((Bt, C_in, L), lambda b: (b, 0, 0))]
                + [_resident(a) for a in args[1:]])

    # Explicit VMEM budget (v7x: 64 MiB physical, 32 MiB default scoped limit).
    param_bytes = sum(int(a.size) * a.dtype.itemsize for a in args[1:])
    io_bytes = 2 * Bt * (C_in + C_out) * L * x.dtype.itemsize
    live_bytes = 12 * C_out * (L + 2 * (k // 2)) * 4
    vmem_limit = int(min(max(param_bytes + io_bytes + live_bytes, 32 * 2**20), 64 * 2**20))

    grid_spec = pltpu.PrefetchScalarGridSpec(
        num_scalar_prefetch=0,
        grid=(B // Bt,),
        in_specs=in_specs,
        out_specs=pl.BlockSpec((Bt, C_out, L), lambda b: (b, 0, 0)),
    )
    windowed_max = pl.pallas_call(
        kernel,
        out_shape=jax.ShapeDtypeStruct((B, C_out, L), x.dtype),
        grid_spec=grid_spec,
        compiler_params=pltpu.CompilerParams(
            dimension_semantics=("parallel",),
            vmem_limit_bytes=vmem_limit),
    )(*args)

    # MaxPool1d down-select: the kernel already holds the pool-window max at every lane whose
    # index is a multiple of pool_size; keep those lanes (trailing, trivially cheap XLA slice).
    return windowed_max[:, :, ::pool_size]


# ---------------------------- pure-JAX reference ---------------------------------
def ref_forward(x, params, *, kernel_size, pool_size, eps=1e-5):
    p = kernel_size // 2

    def conv1d(inp, w, pad):
        return jax.lax.conv_general_dilated(
            inp, w, window_strides=(1,), padding=[(pad, pad)],
            dimension_numbers=("NCH", "OIH", "NCH"))

    def bn(inp, stats):
        gamma, beta, mean, var = stats
        s = gamma / jnp.sqrt(var + eps)
        return inp * s[None, :, None] + (beta - mean * s)[None, :, None]

    out = jax.nn.relu(bn(conv1d(x, params["conv1_w"], p), params["bn1"]))
    out = bn(conv1d(out, params["conv2_w"], p), params["bn2"])
    y = jnp.mean(out, axis=-1)                                   # (B, C_out)
    h = jax.nn.relu(y @ params["se_w1"].T)
    s = jax.nn.sigmoid(h @ params["se_w2"].T)
    out = out * s[:, :, None]
    if "sc_w" in params:
        sc = bn(conv1d(x, params["sc_w"], 0), params["sc_bn"])
    else:
        sc = x
    out = jax.nn.relu(out + sc)
    B, C, Lf = out.shape
    out = out.reshape(B, C, Lf // pool_size, pool_size).max(axis=-1)
    return out  # dropout = identity in inference


if __name__ == "__main__":
    def bn_stats(keys, c):
        kg, kb, km, kv = keys
        gamma = jax.random.uniform(kg, (c,), minval=0.7, maxval=1.3)
        beta = jax.random.normal(kb, (c,)) * 0.1
        mean = jax.random.normal(km, (c,)) * 0.1
        var = jax.random.uniform(kv, (c,), minval=0.8, maxval=1.2)
        return (gamma, beta, mean, var)

    def build(key, B, C_in, C_out, L, k, reduction, with_proj):
        keys = jax.random.split(key, 18)
        H = max(C_out // reduction, 1)
        x = jax.random.normal(keys[0], (B, C_in, L), dtype=jnp.float32)
        params = {
            "conv1_w": jax.random.normal(keys[1], (C_out, C_in, k)) * (1.0 / (C_in * k) ** 0.5),
            "conv2_w": jax.random.normal(keys[2], (C_out, C_out, k)) * (1.0 / (C_out * k) ** 0.5),
            "se_w1":   jax.random.normal(keys[3], (H, C_out)) * (1.0 / C_out ** 0.5),
            "se_w2":   jax.random.normal(keys[4], (C_out, H)) * (1.0 / H ** 0.5),
            "bn1":     bn_stats(keys[6:10], C_out),
            "bn2":     bn_stats(keys[10:14], C_out),
        }
        if with_proj:
            params["sc_w"] = jax.random.normal(keys[5], (C_out, C_in, 1)) * (1.0 / C_in ** 0.5)
            params["sc_bn"] = bn_stats(keys[14:18], C_out)
        return x, params

    key = jax.random.PRNGKey(0)
    k_proj, k_iden = jax.random.split(key)

    configs = [
        # (key,   B, C_in, C_out,  L, k, pool, reduction, with_proj)
        (k_proj,  2,    8,    16, 16, 3,    2,         8, True),   # projection shortcut
        (k_iden,  2,   16,    16, 32, 3,    2,         8, False),  # identity shortcut
    ]
    for (cfg_key, B, C_in, C_out, L, k, pool, red, with_proj) in configs:
        x, params = build(cfg_key, B, C_in, C_out, L, k, red, with_proj)
        out = residual_se_cnn_block(x, params, kernel_size=k, pool_size=pool)
        out = jax.block_until_ready(out)
        ref = ref_forward(x, params, kernel_size=k, pool_size=pool)
        assert out.shape == (B, C_out, L // pool)
        err = float(jnp.max(jnp.abs(out - ref)))
        # bf16 MXU operands (f32 accumulation) -> small drift vs. the all-f32 reference.
        assert err < 1e-1, f"max abs err {err}"

    print("KERNEL_OK")
</pallas_src>

<mosaic_0001>
module attributes {stable_mosaic.version = 11 : i64} {
  func.func @kernel(%arg0: i32, %arg1: memref<1x8x16xf32, #tpu.memory_space<vmem>>, %arg2: memref<16x24xbf16, #tpu.memory_space<vmem>>, %arg3: memref<16x1xf32, #tpu.memory_space<vmem>>, %arg4: memref<16x1xf32, #tpu.memory_space<vmem>>, %arg5: memref<16x48xbf16, #tpu.memory_space<vmem>>, %arg6: memref<16x1xf32, #tpu.memory_space<vmem>>, %arg7: memref<16x1xf32, #tpu.memory_space<vmem>>, %arg8: memref<16x2xf32, #tpu.memory_space<vmem>>, %arg9: memref<16x2xf32, #tpu.memory_space<vmem>>, %arg10: memref<16x8xbf16, #tpu.memory_space<vmem>>, %arg11: memref<16x1xf32, #tpu.memory_space<vmem>>, %arg12: memref<16x1xf32, #tpu.memory_space<vmem>>, %arg13: memref<1x16x16xf32, #tpu.memory_space<vmem>>) attributes {dimension_semantics = [#tpu.dimension_semantics<parallel>], iteration_bounds = array<i64: 2>, scalar_prefetch = 0 : i64, scratch_operands = 0 : i64, tpu.core_type = #tpu.core_type<tc>, window_params = [{transform_indices = @transform_0, window_bounds = array<i64: 1, 8, 16>}, {pipeline_mode = #tpu.pipeline_mode<synchronous>, transform_indices = @transform_1, window_bounds = array<i64: 16, 24>}, {pipeline_mode = #tpu.pipeline_mode<synchronous>, transform_indices = @transform_2, window_bounds = array<i64: 16, 1>}, {pipeline_mode = #tpu.pipeline_mode<synchronous>, transform_indices = @transform_3, window_bounds = array<i64: 16, 1>}, {pipeline_mode = #tpu.pipeline_mode<synchronous>, transform_indices = @transform_4, window_bounds = array<i64: 16, 48>}, {pipeline_mode = #tpu.pipeline_mode<synchronous>, transform_indices = @transform_5, window_bounds = array<i64: 16, 1>}, {pipeline_mode = #tpu.pipeline_mode<synchronous>, transform_indices = @transform_6, window_bounds = array<i64: 16, 1>}, {pipeline_mode = #tpu.pipeline_mode<synchronous>, transform_indices = @transform_7, window_bounds = array<i64: 16, 2>}, {pipeline_mode = #tpu.pipeline_mode<synchronous>, transform_indices = @transform_8, window_bounds = array<i64: 16, 2>}, {pipeline_mode = #tpu.pipeline_mode<synchronous>, transform_indices = @transform_9, window_bounds = array<i64: 16, 8>}, {pipeline_mode = #tpu.pipeline_mode<synchronous>, transform_indices = @transform_10, window_bounds = array<i64: 16, 1>}, {pipeline_mode = #tpu.pipeline_mode<synchronous>, transform_indices = @transform_11, window_bounds = array<i64: 16, 1>}, {transform_indices = @transform_12, window_bounds = array<i64: 1, 16, 16>}]} {
    %c0_i32 = arith.constant 0 : i32
    %0 = arith.index_cast %c0_i32 : i32 to index
    %c0 = arith.constant 0 : index
    %c0_0 = arith.constant 0 : index
    %1 = vector.load %arg1[%0, %c0, %c0_0] : memref<1x8x16xf32, #tpu.memory_space<vmem>>, vector<1x8x16xf32>
    %2 = vector.shape_cast %1 : vector<1x8x16xf32> to vector<8x16xf32>
    %cst = arith.constant 0.000000e+00 : f32
    %3 = vector.broadcast %cst : f32 to vector<8x1xf32>
    %4 = tpu.concatenate %3, %2, %3 in 1 : vector<8x1xf32>, vector<8x16xf32>, vector<8x1xf32> -> vector<8x18xf32>
    %5 = vector.extract_strided_slice %4 {offsets = [0, 0], sizes = [8, 16], strides = [1, 1]} : vector<8x18xf32> to vector<8x16xf32>
    %6 = vector.extract_strided_slice %4 {offsets = [0, 1], sizes = [8, 16], strides = [1, 1]} : vector<8x18xf32> to vector<8x16xf32>
    %7 = vector.extract_strided_slice %4 {offsets = [0, 2], sizes = [8, 16], strides = [1, 1]} : vector<8x18xf32> to vector<8x16xf32>
    %8 = tpu.concatenate %5, %6, %7 in 0 : vector<8x16xf32>, vector<8x16xf32>, vector<8x16xf32> -> vector<24x16xf32>
    %9 = arith.truncf %8 : vector<24x16xf32> to vector<24x16xbf16>
    %c0_1 = arith.constant 0 : index
    %c0_2 = arith.constant 0 : index
    %10 = vector.load %arg2[%c0_1, %c0_2] : memref<16x24xbf16, #tpu.memory_space<vmem>>, vector<16x24xbf16>
    %cst_3 = arith.constant dense<0.000000e+00> : vector<16x16xf32>
    %11 = tpu.matmul %10, %9, %cst_3 {dimension_numbers = #tpu.dot_dimension_numbers<[1], [0], [0], [1], [0, 0, 1, 1], [], []>} : vector<16x24xbf16>, vector<24x16xbf16>, vector<16x16xf32> -> vector<16x16xf32>
    %c0_4 = arith.constant 0 : index
    %c0_5 = arith.constant 0 : index
    %12 = vector.load %arg3[%c0_4, %c0_5] : memref<16x1xf32, #tpu.memory_space<vmem>>, vector<16x1xf32>
    %13 = vector.broadcast %12 : vector<16x1xf32> to vector<16x16xf32>
    %14 = arith.mulf %11, %13 : vector<16x16xf32>
    %c0_6 = arith.constant 0 : index
    %c0_7 = arith.constant 0 : index
    %15 = vector.load %arg4[%c0_6, %c0_7] : memref<16x1xf32, #tpu.memory_space<vmem>>, vector<16x1xf32>
    %16 = vector.broadcast %15 : vector<16x1xf32> to vector<16x16xf32>
    %17 = arith.addf %14, %16 : vector<16x16xf32>
    %cst_8 = arith.constant 0.000000e+00 : f32
    %18 = vector.broadcast %cst_8 : f32 to vector<16x16xf32>
    %19 = arith.maximumf %17, %18 : vector<16x16xf32>
    %cst_9 = arith.constant 0.000000e+00 : f32
    %20 = vector.broadcast %cst_9 : f32 to vector<16x1xf32>
    %21 = tpu.concatenate %20, %19, %20 in 1 : vector<16x1xf32>, vector<16x16xf32>, vector<16x1xf32> -> vector<16x18xf32>
    %22 = vector.extract_strided_slice %21 {offsets = [0, 0], sizes = [16, 16], strides = [1, 1]} : vector<16x18xf32> to vector<16x16xf32>
    %23 = vector.extract_strided_slice %21 {offsets = [0, 1], sizes = [16, 16], strides = [1, 1]} : vector<16x18xf32> to vector<16x16xf32>
    %24 = vector.extract_strided_slice %21 {offsets = [0, 2], sizes = [16, 16], strides = [1, 1]} : vector<16x18xf32> to vector<16x16xf32>
    %25 = tpu.concatenate %22, %23, %24 in 0 : vector<16x16xf32>, vector<16x16xf32>, vector<16x16xf32> -> vector<48x16xf32>
    %26 = arith.truncf %25 : vector<48x16xf32> to vector<48x16xbf16>
    %c0_10 = arith.constant 0 : index
    %c0_11 = arith.constant 0 : index
    %27 = vector.load %arg5[%c0_10, %c0_11] : memref<16x48xbf16, #tpu.memory_space<vmem>>, vector<16x48xbf16>
    %cst_12 = arith.constant dense<0.000000e+00> : vector<16x16xf32>
    %28 = tpu.matmul %27, %26, %cst_12 {dimension_numbers = #tpu.dot_dimension_numbers<[1], [0], [0], [1], [0, 0, 1, 1], [], []>} : vector<16x48xbf16>, vector<48x16xbf16>, vector<16x16xf32> -> vector<16x16xf32>
    %c0_13 = arith.constant 0 : index
    %c0_14 = arith.constant 0 : index
    %29 = vector.load %arg6[%c0_13, %c0_14] : memref<16x1xf32, #tpu.memory_space<vmem>>, vector<16x1xf32>
    %30 = vector.broadcast %29 : vector<16x1xf32> to vector<16x16xf32>
    %31 = arith.mulf %28, %30 : vector<16x16xf32>
    %c0_15 = arith.constant 0 : index
    %c0_16 = arith.constant 0 : index
    %32 = vector.load %arg7[%c0_15, %c0_16] : memref<16x1xf32, #tpu.memory_space<vmem>>, vector<16x1xf32>
    %33 = vector.broadcast %32 : vector<16x1xf32> to vector<16x16xf32>
    %34 = arith.addf %31, %33 : vector<16x16xf32>
    %cst_17 = arith.constant dense<0.000000e+00> : vector<16xf32>
    %35 = vector.multi_reduction <add>, %34, %cst_17 [1] : vector<16x16xf32> to vector<16xf32>
    %36 = vector.shape_cast %35 : vector<16xf32> to vector<16x1xf32>
    %c0_18 = arith.constant 0 : index
    %c0_19 = arith.constant 0 : index
    %37 = vector.load %arg8[%c0_18, %c0_19] : memref<16x2xf32, #tpu.memory_space<vmem>>, vector<16x2xf32>
    %38 = vector.broadcast %36 : vector<16x1xf32> to vector<16x2xf32>
    %39 = arith.mulf %37, %38 : vector<16x2xf32>
    %cst_20 = arith.constant dense<0.000000e+00> : vector<2xf32>
    %40 = vector.multi_reduction <add>, %39, %cst_20 [0] : vector<16x2xf32> to vector<2xf32>
    %41 = vector.shape_cast %40 : vector<2xf32> to vector<1x2xf32>
    %cst_21 = arith.constant 0.000000e+00 : f32
    %42 = vector.broadcast %cst_21 : f32 to vector<1x2xf32>
    %43 = arith.maximumf %41, %42 : vector<1x2xf32>
    %c0_22 = arith.constant 0 : index
    %c0_23 = arith.constant 0 : index
    %44 = vector.load %arg9[%c0_22, %c0_23] : memref<16x2xf32, #tpu.memory_space<vmem>>, vector<16x2xf32>
    %45 = vector.broadcast %43 : vector<1x2xf32> to vector<16x2xf32>
    %46 = arith.mulf %44, %45 : vector<16x2xf32>
    %cst_24 = arith.constant dense<0.000000e+00> : vector<16xf32>
    %47 = vector.multi_reduction <add>, %46, %cst_24 [1] : vector<16x2xf32> to vector<16xf32>
    %48 = vector.shape_cast %47 : vector<16xf32> to vector<16x1xf32>
    %49 = arith.negf %48 : vector<16x1xf32>
    %50 = math.exp %49 : vector<16x1xf32>
    %cst_25 = arith.constant 1.000000e+00 : f32
    %51 = vector.broadcast %cst_25 : f32 to vector<16x1xf32>
    %52 = arith.addf %51, %50 : vector<16x1xf32>
    %53 = arith.divf %51, %52 : vector<16x1xf32>
    %c0_26 = arith.constant 0 : index
    %c0_27 = arith.constant 0 : index
    %54 = vector.load %arg10[%c0_26, %c0_27] : memref<16x8xbf16, #tpu.memory_space<vmem>>, vector<16x8xbf16>
    %55 = arith.truncf %2 : vector<8x16xf32> to vector<8x16xbf16>
    %cst_28 = arith.constant dense<0.000000e+00> : vector<16x16xf32>
    %56 = tpu.matmul %54, %55, %cst_28 {dimension_numbers = #tpu.dot_dimension_numbers<[1], [0], [0], [1], [0, 0, 1, 1], [], []>} : vector<16x8xbf16>, vector<8x16xbf16>, vector<16x16xf32> -> vector<16x16xf32>
    %c0_29 = arith.constant 0 : index
    %c0_30 = arith.constant 0 : index
    %57 = vector.load %arg11[%c0_29, %c0_30] : memref<16x1xf32, #tpu.memory_space<vmem>>, vector<16x1xf32>
    %58 = vector.broadcast %57 : vector<16x1xf32> to vector<16x16xf32>
    %59 = arith.mulf %56, %58 : vector<16x16xf32>
    %c0_31 = arith.constant 0 : index
    %c0_32 = arith.constant 0 : index
    %60 = vector.load %arg12[%c0_31, %c0_32] : memref<16x1xf32, #tpu.memory_space<vmem>>, vector<16x1xf32>
    %61 = vector.broadcast %60 : vector<16x1xf32> to vector<16x16xf32>
    %62 = arith.addf %59, %61 : vector<16x16xf32>
    %63 = vector.broadcast %53 : vector<16x1xf32> to vector<16x16xf32>
    %64 = arith.mulf %34, %63 : vector<16x16xf32>
    %65 = arith.addf %64, %62 : vector<16x16xf32>
    %cst_33 = arith.constant 0.000000e+00 : f32
    %66 = vector.broadcast %cst_33 : f32 to vector<16x16xf32>
    %67 = arith.maximumf %65, %66 : vector<16x16xf32>
    %68 = vector.extract_strided_slice %67 {offsets = [0, 1], sizes = [16, 15], strides = [1, 1]} : vector<16x16xf32> to vector<16x15xf32>
    %69 = vector.extract_strided_slice %67 {offsets = [0, 0], sizes = [16, 1], strides = [1, 1]} : vector<16x16xf32> to vector<16x1xf32>
    %70 = tpu.concatenate %68, %69 in 1 : vector<16x15xf32>, vector<16x1xf32> -> vector<16x16xf32>
    %71 = arith.maximumf %67, %70 : vector<16x16xf32>
    %72 = arith.index_cast %c0_i32 : i32 to index
    %c0_34 = arith.constant 0 : index
    %c0_35 = arith.constant 0 : index
    %73 = vector.load %arg13[%72, %c0_34, %c0_35] : memref<1x16x16xf32, #tpu.memory_space<vmem>>, vector<1x16x16xf32>
    %74 = vector.shape_cast %73 : vector<1x16x16xf32> to vector<16x16xf32>
    %75 = vector.shape_cast %71 : vector<16x16xf32> to vector<1x16x16xf32>
    tpu.vector_store %arg13[%72, %c0_34, %c0_35], %75 {strides = array<i32>} : memref<1x16x16xf32, #tpu.memory_space<vmem>>, vector<1x16x16xf32>,
    %c1_i32 = arith.constant 1 : i32
    return
  }
  func.func @transform_0(%arg0: i32) -> (i32, i32, i32) {
    %c0_i32 = arith.constant 0 : i32
    %c0_i32_0 = arith.constant 0 : i32
    %c0_i32_1 = arith.constant 0 : i32
    return %arg0, %c0_i32, %c0_i32_0 : i32, i32, i32
  }
  func.func @transform_1(%arg0: i32) -> (i32, i32) {
    %c0_i32 = arith.constant 0 : i32
    %c0_i32_0 = arith.constant 0 : i32
    %c0_i32_1 = arith.constant 0 : i32
    return %c0_i32, %c0_i32_0 : i32, i32
  }
  func.func @transform_2(%arg0: i32) -> (i32, i32) {
    %c0_i32 = arith.constant 0 : i32
    %c0_i32_0 = arith.constant 0 : i32
    %c0_i32_1 = arith.constant 0 : i32
    return %c0_i32, %c0_i32_0 : i32, i32
  }
  func.func @transform_3(%arg0: i32) -> (i32, i32) {
    %c0_i32 = arith.constant 0 : i32
    %c0_i32_0 = arith.constant 0 : i32
    %c0_i32_1 = arith.constant 0 : i32
    return %c0_i32, %c0_i32_0 : i32, i32
  }
  func.func @transform_4(%arg0: i32) -> (i32, i32) {
    %c0_i32 = arith.constant 0 : i32
    %c0_i32_0 = arith.constant 0 : i32
    %c0_i32_1 = arith.constant 0 : i32
    return %c0_i32, %c0_i32_0 : i32, i32
  }
  func.func @transform_5(%arg0: i32) -> (i32, i32) {
    %c0_i32 = arith.constant 0 : i32
    %c0_i32_0 = arith.constant 0 : i32
    %c0_i32_1 = arith.constant 0 : i32
    return %c0_i32, %c0_i32_0 : i32, i32
  }
  func.func @transform_6(%arg0: i32) -> (i32, i32) {
    %c0_i32 = arith.constant 0 : i32
    %c0_i32_0 = arith.constant 0 : i32
    %c0_i32_1 = arith.constant 0 : i32
    return %c0_i32, %c0_i32_0 : i32, i32
  }
  func.func @transform_7(%arg0: i32) -> (i32, i32) {
    %c0_i32 = arith.constant 0 : i32
    %c0_i32_0 = arith.constant 0 : i32
    %c0_i32_1 = arith.constant 0 : i32
    return %c0_i32, %c0_i32_0 : i32, i32
  }
  func.func @transform_8(%arg0: i32) -> (i32, i32) {
    %c0_i32 = arith.constant 0 : i32
    %c0_i32_0 = arith.constant 0 : i32
    %c0_i32_1 = arith.constant 0 : i32
    return %c0_i32, %c0_i32_0 : i32, i32
  }
  func.func @transform_9(%arg0: i32) -> (i32, i32) {
    %c0_i32 = arith.constant 0 : i32
    %c0_i32_0 = arith.constant 0 : i32
    %c0_i32_1 = arith.constant 0 : i32
    return %c0_i32, %c0_i32_0 : i32, i32
  }
  func.func @transform_10(%arg0: i32) -> (i32, i32) {
    %c0_i32 = arith.constant 0 : i32
    %c0_i32_0 = arith.constant 0 : i32
    %c0_i32_1 = arith.constant 0 : i32
    return %c0_i32, %c0_i32_0 : i32, i32
  }
  func.func @transform_11(%arg0: i32) -> (i32, i32) {
    %c0_i32 = arith.constant 0 : i32
    %c0_i32_0 = arith.constant 0 : i32
    %c0_i32_1 = arith.constant 0 : i32
    return %c0_i32, %c0_i32_0 : i32, i32
  }
  func.func @transform_12(%arg0: i32) -> (i32, i32, i32) {
    %c0_i32 = arith.constant 0 : i32
    %c0_i32_0 = arith.constant 0 : i32
    %c0_i32_1 = arith.constant 0 : i32
    return %arg0, %c0_i32, %c0_i32_0 : i32, i32, i32
  }
}

</mosaic_0001>

<bundles_post_ra>
// kernel: tpu_custom_call.1
= control target key start
LH: loop header
LB: loop body
LE: loop exit
PB: predicated region body
PF: predicated region fallthrough
CT: control target
= control target key end

     0   :  { %s1338_s0 = inlined_call_operand.vmem [shape: f32[2,8,16], index: 0, kind: input, shape index: {}]   ;;  %s1339_s1 = inlined_call_operand.vmem [shape: bf16[16,24], index: 1, kind: input, shape index: {}]   ;;  %s1340_s2 = inlined_call_operand.vmem [shape: f32[16,1], index: 2, kind: input, shape index: {}]   ;;  %s1341_s3 = inlined_call_operand.vmem [shape: f32[16,1], index: 3, kind: input, shape index: {}]   ;;  %s1342_s4 = inlined_call_operand.vmem [shape: bf16[16,48], index: 4, kind: input, shape index: {}]   ;;  %s1343_s5 = inlined_call_operand.vmem [shape: f32[16,1], index: 5, kind: input, shape index: {}]   ;;  %s1344_s6 = inlined_call_operand.vmem [shape: f32[16,1], index: 6, kind: input, shape index: {}]   ;;  %s1345_s7 = inlined_call_operand.vmem [shape: f32[16,2], index: 7, kind: input, shape index: {}]   ;;  %s1346_s8 = inlined_call_operand.vmem [shape: f32[16,2], index: 8, kind: input, shape index: {}]   ;;  %s1347_s9 = inlined_call_operand.vmem [shape: bf16[16,8], index: 9, kind: input, shape index: {}]   ;;  %s1348_s10 = inlined_call_operand.vmem [shape: f32[16,1], index: 10, kind: input, shape index: {}]   ;;  %s1349_s11 = inlined_call_operand.vmem [shape: f32[16,1], index: 11, kind: input, shape index: {}]   ;;  %s1350_s12 = inlined_call_operand.hbm [shape: f32[2,16,16], index: 12, kind: output, shape index: {}]  }
   0x1   :  { %1353 = sst [smem:[#allocation5_spill]] %s1338_s0 }
   0x2   :  { %17 = vsyncpa [#allocation3], 0 }
   0x3   :  { %19 = vsyncpa [#allocation3 + $0x1], 0  ;;  %s1130_s21 = smov 0   ;;  %s1132_s22 = smov 0  }
   0x4   :  { %s1134_s23 = smov 0   ;;  %s1136_s24 = smov 0  }
   0x5 LB: > { %s1151_s25 = sadd.s32 4294967295, %s1052_s24   ;;  %s854_s26 = sadd.s32 4294967294, %s1052_s24   ;;  %s1052_s24 = sphi %s1136_s24, %s1362_s24   ;;  %s1048_s23 = sphi %s1134_s23, %s1361_s23   ;;  %s1044_s22 = sphi %s1132_s22, %s1360_s22   ;;  %s1040_s21 = sphi %s1130_s21, %s1359_s21  }
   0x6   : > { %s1155_s27 = sadd.s32 1, %s1052_s24   ;;  %s289_s28 = sadd.s32 1, %s1048_s23 }
   0x7   : > { %s286_s29 = ssub.s32 %s1052_s24, %s1155_s27  ;;  %p299_p0 = scmp.ne.s32.totalorder %s1048_s23, %s1044_s22 }
   0x8   : > { %p287_p1 = scmp.eq.s32.totalorder %s286_s29, 0  ;;  %p300_p2 = scmp.eq.s32.totalorder %s1151_s25, 1 }
   0x9   : > { %p305_p3 = scmp.ne.s32.totalorder %s1044_s22, %s1040_s21  ;;  %p306_p4 = scmp.eq.s32.totalorder %s854_s26, 1 }
   0xa   : > { %s1166_s30 = scalar_select %p287_p1, %s1048_s23, %s289_s28  }
   0xb   : > { %p1168_p5 = por %p300_p2, %p299_p0  ;;  %p1172_p6 = por %p306_p4, %p305_p3 }
   0xc   : > { %p857_p7 = scmp.ge.s32.totalorder %s1052_s24, 1  ;;  %p364_p8 = scmp.lt.s32.totalorder %s1052_s24, 3 }
   0xe   : > { %p365_p9 = pnand %p857_p7, %p364_p8 }
   0xf   : > { %p405_p10 = scmp.lt.s32.totalorder (!%p365_p9), %s1151_s25, 1  ;;  %s1356_s0 = sld [smem:[#allocation5_spill]] (!%p365_p9)  ;;  %v1055_v1 = vmov (!%p365_p9), 0.0   ;;  %vm1056_vm0 = vmmov (!%p365_p9), 0   ;;  %vm415_vm1 = vcmask (!%p365_p9), 7168   ;;  %vm417_vm2 = vcmask (!%p365_p9), 138240  }
  0x10   : > { %368 = sbr.rel (%p365_p9) target bundleno = 1433 (0x599), region = 68  ;;  %s1351_s20 = smov (!%p365_p9), 1   ;;  %889 = vmatprep.subr.bf16.mxu0 (!%p365_p9), %v1055_v1  ;;  %897 = vmatprep.subr.bf16.mxu1 (!%p365_p9), %v1055_v1  ;;  %v1057_v3 = vmov (!%p365_p9), 0   ;;  %v484_v6 = vld [vmem:[%s1340_s2] sm:$0xff] (!%p365_p9)  ;;  %v485_v7 = vld [vmem:[%s1340_s2 + $0x8] sm:$0xff] (!%p365_p9)  ;;  %vm1060_vm3 = vmmov (!%p365_p9), 1   ;;  %vm866_vm7 = vmpackc.low (!%p365_p9), %vm417_vm2, %vm417_vm2 }
  0x11   : > { %893 = vmatprep.mubr.msk.bf16.mxu0 (!%p365_p9), %vm1056_vm0, %v1055_v1  ;;  %903 = vmatprep.mubr.msk.bf16.mxu1 (!%p365_p9), %vm1056_vm0, %v1055_v1  ;;  %s1352_s26 = smov (!%p365_p9), 126   ;;  %s1059_s28 = smov (!%p365_p9), 127   ;;  %v498_v8 = vld [vmem:[%s1341_s3] sm:$0xff] (!%p365_p9)  ;;  %v499_v9 = vld [vmem:[%s1341_s3 + $0x8] sm:$0xff] (!%p365_p9)  ;;  %vm861_vm4 = vmpackc.low (!%p365_p9), %vm1060_vm3, %vm417_vm2  ;;  %vm439_vm5 = vcmask (!%p365_p9), 1043456   ;;  %vm435_vm6 = vcmask (!%p365_p9), 195584  }
  0x12   : > { %962 = vset.pattern.permute.xlu1 (!%p365_p9), %v1057_v3  ;;  %963 = vset.pattern.permute.xlu0 (!%p365_p9), %v1057_v3  ;;  %v979_v15 = vld [vmem:[%s1339_s1] sm:$0xff] (!%p365_p9)   ;;  %v596_v40 = vld [vmem:[%s1343_s5 + $0x8] sm:$0xff] (!%p365_p9)  ;;  %vm675_vm8 = vcmask (!%p365_p9), 64512   ;;  %vm550_vm9 = vcmask (!%p365_p9), 392192   ;;  %vm623_vm10 = vcmask (!%p365_p9), 130048   ;;  %vm634_vm11 = vcmask (!%p365_p9), 15360  }
  0x13   : > { %v595_v41 = vld [vmem:[%s1343_s5] sm:$0xff] (!%p365_p9)  ;;  %v610_v43 = vld [vmem:[%s1344_s6 + $0x8] sm:$0xff] (!%p365_p9)  ;;  %s1061_s29 = smov (!%p365_p9), 15   ;;  %vm771_vm12 = vcmask (!%p365_p9), 121856   ;;  %s879_s17 = sshll.u32 (!%p365_p9), %s1151_s25, 8 }
  0x14   : > { %v609_v44 = vld [vmem:[%s1344_s6] sm:$0xff] (!%p365_p9) }
  0x15   : > { %v981_v46 = vld [vmem:[%s1347_s9] sm:$0xff] (!%p365_p9)  }
  0x16   : > { %v980_v55 = vld [vmem:[%s1342_s4] sm:$0xff] (!%p365_p9)  }
  0x17   : > { %s406_s15 = scalar_select %p405_p10, %s1151_s25, 1 }
  0x19   : > { %s859_s16 = sshll.u32 %s406_s15, 3  ;;  %s402_s15 = sand.u32 1, %s1044_s22  }
  0x1a   : > { %s408_s19 = scalar_lea.vmem %s1356_s0, %s859_s16  ;;  %s1297_s25 = scalar_lea.sflag [#allocation3], %s402_s15 }
  0x1b   : > { %v1183_v0 = vld [vmem:[%s408_s19] sm:$0xff] }
  0x1c   : > { %412 = vrot.lane.b32.xlu0 %v1183_v0, %s1351_s20  ;;  %s1357_s20 = smov 1   ;;  %v669_v42 = vpack.c.bf16 %v1183_v0, %v1183_v0 }
  0x1e   : > { %v680_v45 = vsel %vm439_vm5, %v669_v42, 0 }
  0x8e   : > { %v413_v2 = vpop.permute.xlu0 %412 }
  0x8f   : > { %v416_v4 = vsel %vm415_vm1, 0.0, %v413_v2 }
  0x90   : > { %v418_v5 = vsel %vm417_vm2, %v416_v4, 0.0 }
  0x91   : > { %423 = vrot.lane.b32.xlu1 %v418_v5, %s1352_s26  ;;  %420 = vrot.lane.b32.xlu0 %v418_v5, %s1059_s28  ;;  %s1358_s26 = smov 126  }
  0x95   : > { %488 = vperm.xlu1 %962, %v484_v6   ;;  %493 = vperm.xlu0 %963, %v485_v7   ;;  %v724_v6 = vld [vmem:[%s1348_s10 + $0x8] sm:$0xff] }
  0x99   : > { %502 = vperm.xlu1 %962, %v498_v8  }
  0x9d   : > { %507 = vperm.xlu1 %962, %v499_v9  }
 0x103   : > { %v424_v10 = vpop.permute.xlu1 %423  ;;  %v421_v11 = vpop.permute.xlu0 %420 }
 0x104   : > { %v862_v12 = vpack.c.bf16 %v421_v11, %v416_v4  ;;  %v427_v13 = vpack.c.bf16 %v424_v10, %v424_v10  ;;  %v630_v11 = vld [vmem:[%s1345_s7] sm:$0xff] }
 0x106   : > { %890 = vmatpush3.bf16.msk.msra.mxu0 %vm861_vm4, %v862_v12  ;;  %v441_v14 = vsel %vm439_vm5, %v427_v13, 0  ;;  %v631_v13 = vld [vmem:[%s1345_s7 + $0x8] sm:$0xff] }
 0x107   : > { %891 = vmatprep.subr.bf16.mxu0 %v1055_v1 }
 0x10a   : > { %892 = vmatpush3.bf16.msra.mxu0 %v441_v14 }
 0x10b   : > { %907 = vmatprep.subr.bf16.mxu0 %v1055_v1 }
 0x10d   : > { %894 = vmatmul.mubr.msk.bf16.vlgmr.msra.gmra.mrb[0].mxu0 %vm435_vm6, %v979_v15 }
 0x10e   : > { %909 = vmatprep.mubr.msk.bf16.mxu0 %vm1056_vm0, %v1055_v1  ;;  %908 = vmatpush3.bf16.msra.mxu0 %v680_v45 }
 0x114   : > { %v489_v16 = vpop.permute.xlu1 %488  ;;  %v494_v19 = vpop.permute.xlu0 %493 }
 0x115   : > { %910 = vmatmul.mubr.msk.bf16.vlgmr.msra.gmra.mrb[4].mxu0 %vm675_vm8, %v981_v46 }
 0x118   : > { %v503_v17 = vpop.permute.xlu1 %502 }
 0x11c   : > { %v508_v26 = vpop.permute.xlu1 %507 }
 0x1e0   : > { %v477_v18 = vpop.f32.mrb[0].mxu0 }
 0x1e1   : > { %v496_v20 = vmul.f32 %v489_v16, %v477_v18  ;;  %v895_v21 = vpop.f32.mrb[1].mxu0 }
 0x1e2   : > { %v480_v22 = vpop.f32.mrb[2].mxu0 }
 0x1e3   : > { %v510_v23 = vadd.f32 %v503_v17, %v496_v20  ;;  %v497_v24 = vmul.f32 %v494_v19, %v480_v22  ;;  %v896_v25 = vpop.f32.mrb[3].mxu0 }
 0x1e5   : > { %v511_v27 = vadd.f32 %v508_v26, %v497_v24  ;;  %v512_v28 = vmax.f32 %v510_v23, 0.0  ;;  %v646_v26 = vld [vmem:[%s1346_s8 + $0x8] sm:$0xff] }
 0x1e7   : > { %v513_v29 = vmax.f32 %v511_v27, 0.0  ;;  %v645_v27 = vld [vmem:[%s1346_s8] sm:$0xff] }
 0x1e8   : > { %v716_v7 = vpop.f32.mrb[4].mxu0 }
 0x1e9   : > { %v964_v30 = vpack.i.bf16 %v513_v29, %v512_v28  ;;  %v911_v8 = vpop.f32.mrb[5].mxu0 }
 0x1ea   : > { %v719_v9 = vpop.f32.mrb[6].mxu0 }
 0x1eb   : > { %965 = vrot.lane.b32.xlu0 %v964_v30, %s1357_s20  ;;  %v912_v10 = vpop.f32.mrb[7].mxu0  ;;  %s858_s20 = sshll.u32 %s402_s15, 4 }
 0x25d   : > { %v966_v31 = vpop.permute.xlu0 %965 }
 0x25e   : > { %v968_v32 = vunpack.i.h.bf16 %v966_v31  ;;  %v967_v33 = vunpack.i.l.bf16 %v966_v31 }
 0x260   : > { %v523_v34 = vsel %vm415_vm1, 0.0, %v968_v32  ;;  %v522_v35 = vsel %vm415_vm1, 0.0, %v967_v33  ;;  %v737_v33 = vld [vmem:[%s1349_s11] sm:$0xff] }
 0x261   : > { %v525_v36 = vsel %vm417_vm2, %v523_v34, 0.0  ;;  %v524_v37 = vsel %vm417_vm2, %v522_v35, 0.0  ;;  %v867_v38 = vpack.c.bf16 %v523_v34, %v522_v35  ;;  %v723_v34 = vld [vmem:[%s1348_s10] sm:$0xff]  ;;  %v738_v35 = vld [vmem:[%s1349_s11 + $0x8] sm:$0xff] }
 0x262   : > { %v974_v39 = vpack.i.bf16 %v525_v36, %v524_v37 }
 0x263   : > { %898 = vmatpush3.bf16.msk.msra.mxu1 %vm866_vm7, %v867_v38 }
 0x264   : > { %975 = vrot.lane.b32.xlu0 %v974_v39, %s1358_s26  ;;  %970 = vrot.lane.b32.xlu1 %v974_v39, %s1059_s28  ;;  %s404_s26 = scalar_lea.vmem [#allocation2], %s858_s20  ;;  %s1062_s20 = smov [#allocation2]  }
 0x265   : > { %899 = vmatprep.subr.bf16.mxu1 %v1055_v1  ;;  %s792_s16 = sshll.u32 %s404_s26, 4  ;;  %s1293_s16 = int_to_ptr.vmem [resolvable:$true] %s792_s16 }
 0x268   : > { %604 = vperm.xlu0 %963, %v596_v40   ;;  %599 = vperm.xlu1 %962, %v595_v41  }
 0x26c   : > { %618 = vperm.xlu0 %963, %v610_v43   ;;  %613 = vperm.xlu1 %962, %v609_v44  }
 0x2d6   : > { %v976_v47 = vpop.permute.xlu0 %975  ;;  %v971_v48 = vpop.permute.xlu1 %970 }
 0x2d7   : > { %v973_v49 = vunpack.i.h.bf16 %v971_v48  ;;  %v972_v50 = vunpack.i.l.bf16 %v971_v48  ;;  %v978_v51 = vunpack.i.h.bf16 %v976_v47  ;;  %v977_v52 = vunpack.i.l.bf16 %v976_v47 }
 0x2d9   : > { %v541_v53 = vpack.c.bf16 %v973_v49, %v972_v50  ;;  %v542_v54 = vpack.c.bf16 %v978_v51, %v977_v52 }
 0x2db   : > { %900 = vmatpush3.bf16.msra.mxu1 %v541_v53 }
 0x2dc   : > { %901 = vmatprep.subr.bf16.mxu1 %v1055_v1 }
 0x2df   : > { %902 = vmatpush3.bf16.msra.mxu1 %v542_v54 }
 0x2e2   : > { %904 = vmatmul.mubr.msk.bf16.vlgmr.msra.gmra.mrb[0].mxu1 %vm550_vm9, %v980_v55 }
 0x2e7   : > { %v600_v56 = vpop.permute.xlu1 %599  ;;  %v605_v57 = vpop.permute.xlu0 %604 }
 0x2eb   : > { %v614_v61 = vpop.permute.xlu1 %613  ;;  %v619_v1 = vpop.permute.xlu0 %618 }
 0x3b5   : > { %v588_v58 = vpop.f32.mrb[0].mxu1 }
 0x3b6   : > { %v607_v59 = vmul.f32 %v600_v56, %v588_v58  ;;  %v905_v60 = vpop.f32.mrb[1].mxu1 }
 0x3b7   : > { %v591_v62 = vpop.f32.mrb[2].mxu1 }
 0x3b8   : > { %v608_v63 = vmul.f32 %v605_v57, %v591_v62  ;;  %v906_v0 = vpop.f32.mrb[3].mxu1  ;;  %v1250_v2 = vadd.f32 %v614_v61, %v607_v59 }
 0x3ba   : > { %v624_v3 = vsel %vm623_vm10, %v1250_v2, 0.0  ;;  %v622_v4 = vadd.f32 %v619_v1, %v608_v63 }
 0x3bb   : > { %625 = vadd.xlane.f32.xlu1 %v624_v3 }
 0x3bc   : > { %v627_v5 = vsel %vm623_vm10, %v622_v4, 0.0 }
 0x3bd   : > { %628 = vadd.xlane.f32.xlu0 %v627_v5 }
 0x3cc   : > { %732 = vperm.xlu1 %962, %v724_v6  }
 0x448   : > { %v626_v12 = vpop.xlane.xlu1 %625 }
 0x449   : > { %v632_v14 = vmul.f32 %v630_v11, %v626_v12 }
 0x44a   : > { %v629_v15 = vpop.xlane.xlu0 %628 }
 0x44b   : > { %v633_v16 = vmul.f32 %v631_v13, %v629_v15  ;;  %v635_v17 = vsel %vm634_vm11, %v632_v14, 0.0 }
 0x44c   : > { %v733_v36 = vpop.permute.xlu1 %732 }
 0x44d   : > { %v636_v18 = vsel %vm634_vm11, %v633_v16, 0.0  ;;  %v736_v48 = vmul.f32 %v733_v36, %v719_v9 }
 0x44e   : > { %v637_v19 = vadd.f32 %v636_v18, %v635_v17 }
 0x450   : > { %v638_v20 = vrot.slane %v637_v19, 4 }
 0x452   : > { %v639_v21 = vadd.f32 %v638_v20, %v637_v19 }
 0x454   : > { %v640_v22 = vrot.slane %v639_v21, 2 }
 0x456   : > { %v641_v23 = vadd.f32 %v640_v22, %v639_v21 }
 0x458   : > { %v642_v24 = vrot.slane %v641_v23, 1 }
 0x45a   : > { %v643_v25 = vadd.f32 %v642_v24, %v641_v23 }
 0x45c   : > { %v644_v28 = vmax.f32 %v643_v25, 0.0 }
 0x45e   : > { %v648_v29 = vmul.f32 %v646_v26, %v644_v28  ;;  %v647_v30 = vmul.f32 %v645_v27, %v644_v28 }
 0x460   : > { %v652_v31 = vsel %vm634_vm11, %v648_v29, 0.0  ;;  %v649_v32 = vsel %vm634_vm11, %v647_v30, 0.0 }
 0x461   : > { %653 = vadd.xlane.f32.xlu1 %v652_v31  ;;  %650 = vadd.xlane.f32.xlu0 %v649_v32 }
 0x472   : > { %741 = vperm.xlu1 %962, %v737_v33  }
 0x477   : > { %727 = vperm.xlu0 %963, %v723_v34  }
 0x47b   : > { %746 = vperm.xlu0 %963, %v738_v35  }
 0x4ee   : > { %v654_v37 = vpop.xlane.xlu1 %653  ;;  %v651_v38 = vpop.xlane.xlu0 %650 }
 0x4ef   : > { %v871_v39 = vmul.f32 -1.442695, %v654_v37  ;;  %v870_v40 = vmul.f32 -1.442695, %v651_v38 }
 0x4f1   : > { %982 = vpow2.f32 %v871_v39 }
 0x4f2   : > { %984 = vpow2.f32 %v870_v40  ;;  %v742_v51 = vpop.permute.xlu1 %741 }
 0x4f6   : > { %v728_v45 = vpop.permute.xlu0 %727 }
 0x4f7   : > { %v735_v46 = vmul.f32 %v728_v45, %v716_v7 }
 0x4f9   : > { %v749_v54 = vadd.f32 %v742_v51, %v735_v46 }
 0x4fa   : > { %v747_v47 = vpop.permute.xlu0 %746 }
 0x4fb   : > { %v983_v41 = vpop.eup %982  ;;  %v750_v53 = vadd.f32 %v747_v47, %v736_v48 }
 0x4fc   : > { %v985_v42 = vpop.eup %984  ;;  %v662_v43 = vadd.f32 1.0, %v983_v41 }
 0x4fd   : > { %v661_v44 = vadd.f32 1.0, %v985_v42 }
 0x4fe   : > { %986 = vrcp.f32 %v662_v43 }
 0x4ff   : > { %988 = vrcp.f32 %v661_v44 }
 0x508   : > { %v987_v49 = vpop.eup %986 }
 0x509   : > { %v989_v50 = vpop.eup %988  ;;  %v752_v52 = vmul.f32 %v987_v49, %v622_v4 }
 0x50a   : > { %v751_v55 = vmul.f32 %v989_v50, %v1250_v2 }
 0x50b   : > { %v754_v56 = vadd.f32 %v752_v52, %v750_v53 }
 0x50c   : > { %v753_v57 = vadd.f32 %v751_v55, %v749_v54 }
 0x50d   : > { %v756_v58 = vmax.f32 %v754_v56, 0.0 }
 0x50e   : > { %v755_v59 = vmax.f32 %v753_v57, 0.0 }
 0x50f   : > { %761 = vrot.lane.b32.xlu0 %v756_v58, %s1059_s28 }
 0x510   : > { %759 = vrot.lane.b32.xlu1 %v755_v59, %s1059_s28  ;;  %s1291_s28 = scalar_lea.hbm %s1350_s12, %s879_s17  ;;  %s994_s17 = sshll.u32 %s1062_s20, 4  ;;  %s995_s17 = int_to_ptr.vmem [resolvable:$false] %s994_s17 }
 0x511   : > { %s996_s18 = scalar_lea.vmem %s995_s17, 512  ;;  %p997_p0 = scmp.lt.s32.totalorder %s1293_s16, %s995_s17 }
 0x513   : > { %767 = vrot.lane.b32.xlu0 %v756_v58, %s1061_s29 }
 0x514   : > { %765 = vrot.lane.b32.xlu1 %v755_v59, %s1061_s29  ;;  %s990_s29 = scalar_lea.vmem %s1293_s16, 256 }
 0x515   : > { %p991_p11 = scmp.ne.s32.totalorder %s1293_s16, %s990_s29  ;;  %p998_p1 = scmp.lt.s32.totalorder %s996_s18, %s990_s29 }
 0x517   : > { %p992_p12 = pnand %p991_p11, %p1168_p5  ;;  %p999_p2 = por %p998_p1, %p997_p0 }
 0x519   : > { %p993_p13 = pneg %p992_p12 }
 0x51b   : > { %p1000_p3 = pnand %p999_p2, %p993_p13 }
 0x581   : > { %v762_v60 = vpop.permute.xlu0 %761 }
 0x582   : > { %v760_v61 = vpop.permute.xlu1 %759 }
 0x585   : > { %v768_v62 = vpop.permute.xlu0 %767 }
 0x586   : > { %v766_v63 = vpop.permute.xlu1 %765  ;;  %v773_v0 = vsel %vm771_vm12, %v762_v60, %v768_v62 }
 0x587   : > { %v772_v2 = vsel %vm771_vm12, %v760_v61, %v766_v63  ;;  %v775_v1 = vmax.f32 %v756_v58, %v773_v0 }
 0x588   : > { %v774_v3 = vmax.f32 %v755_v59, %v772_v2 }
 0x589   : > { %777 = vst.msk [vmem:[%s404_s26 + $0x8] sm:$0xff] %vm623_vm10, %v775_v1 }
 0x58a   : > { %776 = vst.msk [vmem:[%s404_s26] sm:$0xff] %vm623_vm10, %v774_v3 }
 0x58b   : > { %1003 = shalt.err (!%p1000_p3)
}
 0x58c   : > { %s1004_s15 = scalar_lea.hbm %s1291_s28, 256  ;;  %s1008_s20 = scalar_lea.hbm %s1350_s12, 512 }
 0x58d   : > { %p1005_p4 = scmp.ne.s32.totalorder %s1291_s28, %s1004_s15  ;;  %p1009_p9 = scmp.lt.u32.totalorder %s1291_s28, %s1350_s12 }
 0x58e   : > { %p1010_p10 = scmp.lt.u32.totalorder %s1008_s20, %s1004_s15  ;;  %p1012_p12 = scmp.lt.u32.totalorder %s1004_s15, %s1291_s28 }
 0x58f   : > { %p1006_p7 = pnand %p1005_p4, %p1168_p5 }
 0x590   : > { %p1011_p11 = por %p1010_p10, %p1009_p9 }
 0x591   : > { %p1007_p8 = pneg %p1006_p7 }
 0x592   : > { %p1013_p13 = por %p1012_p12, %p1011_p11 }
 0x594   : > { %p1014_p0 = pnand %p1013_p13, %p1007_p8 }
 0x596   : > { %1017 = shalt.err (!%p1014_p0)
}
 0x597   : > { %s1063_s29 = smov 128   ;;  %s1064_s18 = smov 8  }
 0x598   : > { %913 = dma.vmem_to_hbm [thread:$0]  (%p1168_p5), %s1293_s16, 256, %s1291_s28, %s1297_s25, %s1063_s29, %s1063_s29, %s1064_s18  }
 0x599 PF: > { %p919_p1 = scmp.ge.s32.totalorder %s1052_s24, 2  ;;  %s807_s0 = sand.u32 1, %s1040_s21  }
 0x59a   : > { %s808_s15 = scalar_lea.sflag [#allocation3], %s807_s0 }
 0x59b   : > { %p916_p2 = pnand %p919_p1, %p1172_p6 }
 0x59d   : > { %1035 = dma.done.wait (!%p916_p2), %s808_s15, 256  }
 0x59e   : > { %1037 = vsyncadd (!%p916_p2), %s808_s15, 4294967040  ;;  %p22_p3 = scmp.ge.s32.totalorder %s1155_s27, 4   ;;  %s1359_s21 = smov %s1044_s22 }
 0x59f   : > { %s1360_s22 = smov %s1048_s23  ;;  %s1361_s23 = smov %s1166_s30 }
 0x5a0   : > { %s1362_s24 = smov %s1155_s27  ;;  %24 = sbr.rel (!%p22_p3) target bundleno = 5 (0x5), region = 103 }
 0x5a7   :  { %813 = vsyncpa [#allocation3], 1 }
 0x5a8   :  { %815 = vsyncpa [#allocation3 + $0x1], 1 }

</bundles_post_ra>
